<compile_context>
chip_gen: v7x
topology: tpu7x:2x2x1
jax: 0.10.0
libtpu: 0.0.40
codegen_flags: <defaults>
</compile_context>

<pallas_src>
import functools

import jax
import jax.numpy as jnp
from jax.experimental import pallas as pl
from jax.experimental.pallas import tpu as pltpu


# ----------------------------------------------------------------------------
# Kernels
# ----------------------------------------------------------------------------
def _open_layer_small_kernel(x_ref, w_ref, b_ref, o_ref):
    """Single-block path: whole x, w, b, out resident in VMEM."""
    acc = jnp.dot(x_ref[...], w_ref[...], preferred_element_type=jnp.float32)
    o_ref[...] = jnp.tanh(acc + b_ref[...]).astype(o_ref.dtype)


def _open_layer_tiled_kernel_f32(x_ref, w_ref, b_ref, o_ref):
    """Tiled path, f32 output: accumulate directly into the resident output
    tile (no scratch), tanh in place at the last K step."""
    k = pl.program_id(2)
    partial = jnp.dot(x_ref[...], w_ref[...], preferred_element_type=jnp.float32)

    @pl.when(k == 0)
    def _init():
        # Fold the bias into the first accumulate (no separate full-tile store).
        o_ref[...] = partial + b_ref[...]

    @pl.when(k > 0)
    def _acc():
        o_ref[...] += partial

    @pl.when(k == pl.num_programs(2) - 1)
    def _finalize():
        o_ref[...] = jnp.tanh(o_ref[...])


def _open_layer_tiled_kernel_scratch(x_ref, w_ref, b_ref, o_ref, acc_ref):
    """Tiled path, narrow output dtype: f32 VMEM accumulator + cast epilogue."""
    k = pl.program_id(2)
    partial = jnp.dot(x_ref[...], w_ref[...], preferred_element_type=jnp.float32)

    @pl.when(k == 0)
    def _init():
        acc_ref[...] = partial + b_ref[...]

    @pl.when(k > 0)
    def _acc():
        acc_ref[...] += partial

    @pl.when(k == pl.num_programs(2) - 1)
    def _finalize():
        o_ref[...] = jnp.tanh(acc_ref[...]).astype(o_ref.dtype)


# ----------------------------------------------------------------------------
# Tiling helpers
# ----------------------------------------------------------------------------
def _round_up(x, m):
    return (x + m - 1) // m * m


def _even_split(dim, target, align):
    """Round `dim` up to `align`, then split it into `grid` blocks of size
    `tile` (a multiple of `align`, at most ~`target`), minimizing padding.
    Returns (tile, grid, padded_dim)."""
    padded = _round_up(dim, align)
    tile = min(_round_up(target, align), padded)
    grid = pl.cdiv(padded, tile)
    tile = _round_up(pl.cdiv(padded, grid), align)
    return tile, grid, tile * grid


# ----------------------------------------------------------------------------
# pallas_call wrappers
# ----------------------------------------------------------------------------
@jax.jit
def _open_layer_small(x, w, b2):
    batch = x.shape[0]
    width = w.shape[1]
    # No grid, no BlockSpecs: whole (small) arrays placed in VMEM; the (8,128)
    # block constraint does not apply when block == full array dims.
    return pl.pallas_call(
        _open_layer_small_kernel,
        out_shape=jax.ShapeDtypeStruct((batch, width), x.dtype),
    )(x, w, b2)


@functools.partial(
    jax.jit,
    static_argnames=("batch", "width", "in_f", "tile_k", "grid_k",
                     "tile_n", "grid_n", "in_dtype"))
def _open_layer_tiled(x, wp, bp, *, batch, width, in_f, tile_k, grid_k,
                      tile_n, grid_n, in_dtype):
    out_dtype = x.dtype
    Kp = tile_k * grid_k
    Np = tile_n * grid_n

    # M tiling: large tiles, bf16-friendly (multiple of 16) row counts.
    tile_m, grid_m, Mp = _even_split(batch, 512, 16)
    # Only force an M split when there is no other grid parallelism to feed
    # the second v7x TensorCore (splitting M re-reads w grid_m times).
    if grid_m * grid_n < 2 and batch > 16:
        half = _round_up(pl.cdiv(_round_up(batch, 16), 2), 16)
        tile_m, grid_m, Mp = _even_split(batch, half, 16)

    # Per-call padding/cast only for x (small vs the pre-padded static weight).
    xp = jnp.pad(x, ((0, Mp - batch), (0, Kp - in_f))).astype(in_dtype)

    use_scratch = out_dtype != jnp.float32
    kernel = (_open_layer_tiled_kernel_scratch if use_scratch
              else _open_layer_tiled_kernel_f32)
    scratch = [pltpu.VMEM((tile_m, tile_n), jnp.float32)] if use_scratch else []

    in_item = jnp.dtype(in_dtype).itemsize
    out_item = jnp.dtype(out_dtype).itemsize

    # VMEM budget: double-buffered in/out tiles (+ optional f32 accumulator),
    # capped at 48 MiB to leave headroom on v7x's 64 MiB per-core VMEM.
    needed = (2 * (tile_m * tile_k * in_item
                   + tile_k * tile_n * in_item
                   + tile_n * 4
                   + tile_m * tile_n * out_item)
              + (tile_m * tile_n * 4 if use_scratch else 0))
    vmem_limit = int(min(max(needed * 6 // 5 + (4 << 20), 32 << 20), 48 << 20))

    cost = pl.CostEstimate(
        flops=2 * Mp * Kp * Np,
        transcendentals=Mp * Np,
        bytes_accessed=(grid_n * Mp * Kp * in_item      # x re-read per N tile
                        + grid_m * Kp * Np * in_item    # w re-read per M tile
                        + Np * 4                        # bias
                        + Mp * Np * out_item),          # output
    )

    out_padded = pl.pallas_call(
        kernel,
        out_shape=jax.ShapeDtypeStruct((Mp, Np), out_dtype),
        grid_spec=pltpu.PrefetchScalarGridSpec(
            num_scalar_prefetch=0,
            grid=(grid_m, grid_n, grid_k),
            in_specs=[
                pl.BlockSpec((tile_m, tile_k), lambda i, j, k: (i, k)),
                pl.BlockSpec((tile_k, tile_n), lambda i, j, k: (k, j)),
                pl.BlockSpec((1, tile_n), lambda i, j, k: (0, j)),
            ],
            out_specs=pl.BlockSpec((tile_m, tile_n), lambda i, j, k: (i, j)),
            scratch_shapes=scratch,
        ),
        compiler_params=pltpu.CompilerParams(
            dimension_semantics=("parallel", "parallel", "arbitrary"),
            vmem_limit_bytes=vmem_limit,
        ),
        cost_estimate=cost,
    )(xp, wp, bp)

    return out_padded[:batch, :width]


# ----------------------------------------------------------------------------
# OpenLayer module equivalent
# ----------------------------------------------------------------------------
class OpenLayerPallas:
    """tanh(x @ w + b) — Pallas TPU implementation of OpenLayer.

    w: [input_size, width] (i.e. nn.Linear weight transposed), b: [width].
    Weights are padded/cast once at construction (they are static), so the
    per-call kernel never pays a w pad/cast HBM round-trip.
    """

    _SMALL_F32_BYTES = 2 << 20  # single-block fast-path threshold

    def __init__(self, w, b, *, use_bf16=True):
        self.in_f, self.width = w.shape
        self.use_bf16 = use_bf16
        self.in_dtype = jnp.bfloat16 if use_bf16 else jnp.float32

        self.w = jnp.asarray(w, jnp.float32)
        self.b2 = jnp.asarray(b, jnp.float32).reshape(1, self.width)

        # K/N tiling depends only on the weight shape -> precompute once.
        self.tile_k, self.grid_k, self.Kp = _even_split(
            self.in_f, 2048 if use_bf16 else 1024, 128)
        self.tile_n, self.grid_n, self.Np = _even_split(self.width, 512, 128)

        # Pre-pad + pre-cast the weight and bias ONCE, outside the per-call jit.
        self.wp = jnp.pad(
            self.w,
            ((0, self.Kp - self.in_f), (0, self.Np - self.width)),
        ).astype(self.in_dtype)
        self.bp = jnp.pad(self.b2, ((0, 0), (0, self.Np - self.width)))

    def __call__(self, x):
        batch = x.shape[0]
        total_f32_bytes = 4 * (batch * self.in_f + self.in_f * self.width
                               + self.width + batch * self.width)
        if total_f32_bytes <= self._SMALL_F32_BYTES:
            # Small problem: single VMEM block, full f32, no padding/grid.
            return _open_layer_small(x, self.w, self.b2)
        return _open_layer_tiled(
            x, self.wp, self.bp,
            batch=batch, width=self.width, in_f=self.in_f,
            tile_k=self.tile_k, grid_k=self.grid_k,
            tile_n=self.tile_n, grid_n=self.grid_n,
            in_dtype=self.in_dtype)


if __name__ == "__main__":
    # --- Small shapes consistent with OpenLayer(input_size, width) ----------
    batch, input_size, width = 16, 32, 64

    key = jax.random.PRNGKey(0)
    kx, kw, kb = jax.random.split(key, 3)

    x = jax.random.normal(kx, (batch, input_size), dtype=jnp.float32)
    # Deterministic init matching nn.Linear's uniform bound 1/sqrt(fan_in).
    bound = float(input_size) ** -0.5
    w = jax.random.uniform(kw, (input_size, width), jnp.float32, -bound, bound)
    b = jax.random.uniform(kb, (width,), jnp.float32, -bound, bound)

    layer = OpenLayerPallas(w, b, use_bf16=True)
    out = jax.block_until_ready(layer(x))

    ref = jnp.tanh(x @ w + b)
    assert out.shape == (batch, width)
    assert jnp.allclose(out, ref, atol=5e-3, rtol=5e-3), float(
        jnp.max(jnp.abs(out - ref)))

    # --- Also exercise the tiled (grid) path at a larger, irregular shape ----
    batch2, in2, width2 = 256, 1024, 640
    kx2, kw2, kb2 = jax.random.split(jax.random.PRNGKey(1), 3)
    bound2 = float(in2) ** -0.5
    x2 = jax.random.normal(kx2, (batch2, in2), dtype=jnp.float32)
    w2 = jax.random.uniform(kw2, (in2, width2), jnp.float32, -bound2, bound2)
    b2 = jax.random.uniform(kb2, (width2,), jnp.float32, -bound2, bound2)

    layer2 = OpenLayerPallas(w2, b2, use_bf16=True)
    out2 = jax.block_until_ready(layer2(x2))
    ref2 = jnp.tanh(x2 @ w2 + b2)
    assert out2.shape == (batch2, width2)
    # bf16 MXU operands (f32 accumulation) vs the f32 PyTorch semantics;
    # use use_bf16=False for full-f32 math if tighter accuracy is needed.
    assert jnp.allclose(out2, ref2, atol=5e-2, rtol=5e-2), float(
        jnp.max(jnp.abs(out2 - ref2)))

    print("KERNEL_OK")
</pallas_src>

<mosaic_0001>
module attributes {stable_mosaic.version = 11 : i64} {
  func.func @_open_layer_small_kernel(%arg0: memref<16x32xf32, #tpu.memory_space<vmem>>, %arg1: memref<32x64xf32, #tpu.memory_space<vmem>>, %arg2: memref<1x64xf32, #tpu.memory_space<vmem>>, %arg3: memref<16x64xf32, #tpu.memory_space<vmem>>) attributes {dimension_semantics = [], scalar_prefetch = 0 : i64, scratch_operands = 0 : i64, tpu.core_type = #tpu.core_type<tc>} {
    %c0 = arith.constant 0 : index
    %c0_0 = arith.constant 0 : index
    %0 = vector.load %arg0[%c0, %c0_0] : memref<16x32xf32, #tpu.memory_space<vmem>>, vector<16x32xf32>
    %c0_1 = arith.constant 0 : index
    %c0_2 = arith.constant 0 : index
    %1 = vector.load %arg1[%c0_1, %c0_2] : memref<32x64xf32, #tpu.memory_space<vmem>>, vector<32x64xf32>
    %cst = arith.constant dense<0.000000e+00> : vector<16x64xf32>
    %2 = tpu.matmul %0, %1, %cst {dimension_numbers = #tpu.dot_dimension_numbers<[1], [0], [0], [1], [0, 0, 1, 1], [], []>} : vector<16x32xf32>, vector<32x64xf32>, vector<16x64xf32> -> vector<16x64xf32>
    %c0_3 = arith.constant 0 : index
    %c0_4 = arith.constant 0 : index
    %3 = vector.load %arg2[%c0_3, %c0_4] : memref<1x64xf32, #tpu.memory_space<vmem>>, vector<1x64xf32>
    %4 = vector.broadcast %3 : vector<1x64xf32> to vector<16x64xf32>
    %5 = arith.addf %2, %4 : vector<16x64xf32>
    %6 = math.tanh %5 : vector<16x64xf32>
    %c0_5 = arith.constant 0 : index
    %c0_6 = arith.constant 0 : index
    %7 = vector.load %arg3[%c0_5, %c0_6] : memref<16x64xf32, #tpu.memory_space<vmem>>, vector<16x64xf32>
    tpu.vector_store %arg3[%c0_5, %c0_6], %6 {strides = array<i32>} : memref<16x64xf32, #tpu.memory_space<vmem>>, vector<16x64xf32>,
    return
  }
}

</mosaic_0001>

<bundles_post_ra>
// kernel: _open_layer_small.1
= control target key start
LH: loop header
LB: loop body
LE: loop exit
PB: predicated region body
PF: predicated region fallthrough
CT: control target
= control target key end

     0   :  { %8 = vsyncpa [#allocation3], 0  ;;  %s343_s0 = inlined_call_operand.hbm [shape: f32[16,32], index: 0, kind: input, shape index: {}]   ;;  %s344_s1 = inlined_call_operand.hbm [shape: f32[32,64], index: 1, kind: input, shape index: {}]   ;;  %s345_s2 = inlined_call_operand.vmem [shape: f32[1,64], index: 2, kind: input, shape index: {}]   ;;  %s346_s3 = inlined_call_operand.hbm [shape: f32[16,64], index: 3, kind: output, shape index: {}]  }
   0x1   :  { %9 = vsyncpa [#allocation6], 0 }
   0x2   :  { %10 = vsyncpa [#allocation4], 0  ;;  %s270_s12 = smov [#allocation2]   ;;  %s198_s16 = scalar_lea.hbm %s343_s0, 256 }
   0x3   :  { %s16_s13 = sshll.u32 %s270_s12, 4  ;;  %p199_p0 = scmp.ne.s32.totalorder %s343_s0, %s198_s16  ;;  %s17_s13 = int_to_ptr.vmem [resolvable:$true] %s16_s13 }
   0x4   :  { %p202_p1 = scmp.lt.u32.totalorder %s198_s16, %s343_s0 }
   0x6   :  { %p204_p2 = pnand %p202_p1, %p199_p0 }
   0x8   :  { %207 = shalt.err (!%p204_p2)
}
   0x9   :  { %s208_s21 = scalar_lea.vmem %s17_s13, 256  ;;  %p213_p4 = scmp.lt.s32.totalorder %s17_s13, %s17_s13 }
   0xa   :  { %p209_p3 = scmp.ne.s32.totalorder %s17_s13, %s208_s21  ;;  %p214_p5 = scmp.lt.s32.totalorder %s208_s21, %s208_s21 }
   0xc   :  { %p215_p6 = por %p214_p5, %p213_p4 }
   0xe   :  { %p216_p7 = pnand %p215_p6, %p209_p3 }
  0x10   :  { %219 = shalt.err (!%p216_p7)
}
  0x11   :  { %s271_s22 = smov 128   ;;  %s272_s23 = smov 8  }
  0x12   :  { %22 = dma.hbm_to_vmem [thread:$0]  %s343_s0, 256, %s17_s13, [#allocation3], %s271_s22, %s271_s22, %s272_s23  }
  0x13   :  { %s273_s26 = smov [#allocation5]   ;;  %s220_s30 = scalar_lea.hbm %s344_s1, 512 }
  0x14   :  { %s28_s27 = sshll.u32 %s273_s26, 4  ;;  %p221_p8 = scmp.ne.s32.totalorder %s344_s1, %s220_s30  ;;  %s29_s27 = int_to_ptr.vmem [resolvable:$true] %s28_s27 }
  0x15   :  { %p224_p9 = scmp.lt.u32.totalorder %s220_s30, %s344_s1 }
  0x17   :  { %p226_p10 = pnand %p224_p9, %p221_p8 }
  0x19   :  { %229 = shalt.err (!%p226_p10)
}
  0x1a   :  { %s230_s8 = scalar_lea.vmem %s29_s27, 512  ;;  %p235_p12 = scmp.lt.s32.totalorder %s29_s27, %s29_s27 }
  0x1b   :  { %p231_p11 = scmp.ne.s32.totalorder %s29_s27, %s230_s8  ;;  %p236_p13 = scmp.lt.s32.totalorder %s230_s8, %s230_s8 }
  0x1d   :  { %p237_p0 = por %p236_p13, %p235_p12 }
  0x1f   :  { %p238_p1 = pnand %p237_p0, %p231_p11 }
  0x21   :  { %241 = shalt.err (!%p238_p1)
}
  0x22   :  { %34 = dma.hbm_to_vmem [thread:$0]  %s344_s1, 512, %s29_s27, [#allocation6], %s271_s22, %s271_s22, %s272_s23  }
  0x23   :  { %264 = dma.done.wait [#allocation3], 256  }
  0x24   :  { %265 = vsyncadd [#allocation3], 4294967040 }
  0x25   :  { %266 = dma.done.wait [#allocation6], 512  }
  0x26   :  { %267 = vsyncadd [#allocation6], 4294966784  ;;  %vm56_vm0 = vcmask 261120   ;;  %v45_v0 = vld [vmem:[#allocation5] sm:$0xff]  ;;  %v46_v1 = vld [vmem:[#allocation5 + $0x8] sm:$0xff]  ;;  %s274_s11 = smov [#allocation7]  }
  0x27   :  { %v47_v2 = vld [vmem:[#allocation5 + $0x10] sm:$0xff]  ;;  %v181_v3 = vpack.c.bf16 %v46_v1, %v45_v0  ;;  %v48_v4 = vld [vmem:[#allocation5 + $0x18] sm:$0xff]  ;;  %s148_s12 = sshll.u32 %s274_s11, 4  ;;  %vm140_vm1 = vcmask 523264   ;;  %s149_s12 = int_to_ptr.vmem [resolvable:$true] %s148_s12 }
  0x28   :  { %v43_v5 = vld [vmem:[#allocation2] sm:$0xff]  ;;  %v185_v6 = vpack.c.bf16 %v48_v4, %v47_v2  ;;  %v44_v7 = vld [vmem:[#allocation2 + $0x8] sm:$0xff]  ;;  %s242_s13 = scalar_lea.vmem %s149_s12, 256  ;;  %p247_p3 = scmp.lt.s32.totalorder %s149_s12, %s149_s12 }
  0x29   :  { %178 = vmatprep.mubr.msk.f32.mxu0 %vm56_vm0, %v43_v5  ;;  %182 = vmatprep.subr.bf16.mxu0 %v181_v3  ;;  %v161_v8 = vld [vmem:[%s345_s2] ss:$0 sm:$0xff]  ;;  %p243_p2 = scmp.ne.s32.totalorder %s149_s12, %s242_s13  ;;  %p248_p4 = scmp.lt.s32.totalorder %s242_s13, %s242_s13 }
  0x2a   :  { %184 = vmatpush3.bf16.msra.mxu0 %v181_v3 }
  0x2b   :  { %186 = vmatprep.subr.bf16.mxu0 %v185_v6  ;;  %p249_p5 = por %p248_p4, %p247_p3 }
  0x2d   :  { %p250_p6 = pnand %p249_p5, %p243_p2 }
  0x2e   :  { %188 = vmatpush3.bf16.msra.mxu0 %v185_v6 }
  0x31   :  { %179 = vmatmul.mubr.msk.f32.vlgmr.msra.gmra.mrb[0].mxu0 %vm56_vm0, %v44_v7 }
 0x104   :  { %v180_v9 = vpop.f32.mrb[0].mxu0 }
 0x105   :  { %v135_v10 = vadd.f32 %v180_v9, %v161_v8  ;;  %v129_v11 = vpop.f32.mrb[1].mxu0 }
 0x106   :  { %v130_v12 = vadd.f32 %v161_v8, %v129_v11 }
 0x107   :  { %194 = vtanh.f32 %v135_v10 }
 0x108   :  { %196 = vtanh.f32 %v130_v12 }
 0x111   :  { %v195_v13 = vpop.eup %194 }
 0x112   :  { %v197_v14 = vpop.eup %196  ;;  %142 = vst.msk [vmem:[#allocation7 + $0x8] sm:$0xff] %vm140_vm1, %v195_v13 }
 0x113   :  { %141 = vst.msk [vmem:[#allocation7] sm:$0xff] %vm140_vm1, %v197_v14 }
 0x114   :  { %253 = shalt.err (!%p250_p6)
}
 0x115   :  { %s254_s15 = scalar_lea.hbm %s346_s3, 256 }
 0x116   :  { %p255_p7 = scmp.ne.s32.totalorder %s346_s3, %s254_s15  ;;  %p258_p8 = scmp.lt.u32.totalorder %s254_s15, %s346_s3 }
 0x118   :  { %p260_p9 = pnand %p258_p8, %p255_p7 }
 0x11a   :  { %263 = shalt.err (!%p260_p9)
}
 0x11b   :  { %154 = dma.vmem_to_hbm [thread:$0]  %s149_s12, 256, %s346_s3, [#allocation4], %s271_s22, %s271_s22, %s272_s23  }
 0x11c   :  { %268 = dma.done.wait [#allocation4], 256  }
 0x11d   :  { %269 = vsyncadd [#allocation4], 4294967040 }
 0x11e   :  { %158 = vsyncpa [#allocation3], 1 }
 0x11f   :  { %159 = vsyncpa [#allocation6], 1 }
 0x120   :  { %160 = vsyncpa [#allocation4], 1 }

</bundles_post_ra>
